<compile_context>
chip_gen: v7x
topology: tpu7x:2x2x1
jax: 0.10.0
libtpu: 0.0.40
codegen_flags: <defaults>
</compile_context>

<pallas_src>
import functools

import jax
import jax.numpy as jnp
from jax.experimental import pallas as pl
from jax.experimental.pallas import tpu as pltpu


def _mask_weighted_avg_pool_kernel(masks_ref, feat_ref, out_ref, *, inv_hw):
    # masks_ref: (Nb, M, HW), feat_ref: (Nb, D, HW), out_ref: (Nb, M, D)
    # Masked multiply + global average pool over (H, W) fuses into one batched
    # MXU matmul contracting over HW: sum_{hw} masks[b, m, hw] * feat[b, d, hw].
    acc = jnp.einsum(
        'bmh,bdh->bmd', masks_ref[...], feat_ref[...],
        preferred_element_type=jnp.float32)            # (Nb, M, D), f32 accum
    out_ref[...] = (acc * inv_hw).astype(out_ref.dtype)


def _pick_batch_tile(n, m, d, hw, itemsize, vmem_budget_bytes=8 * 1024 * 1024):
    """Largest divisor of n whose double-buffered input blocks fit the budget.

    Budget is kept well under v5e's 16 MiB default scoped VMEM and v7x's
    64 MiB physical VMEM, so no vmem_limit_bytes override is needed.
    """
    per_n = 2 * (m + d) * hw * itemsize          # x2 pipeline buffers
    max_nb = max(1, int(vmem_budget_bytes // per_n))
    if n >= 2:
        # Keep >= 2 grid steps so the "parallel" axis can shard across both
        # TensorCores on v7x (no-op on single-TC v5e/v6e).
        max_nb = min(max_nb, max(1, n // 2))
    max_nb = min(max_nb, n)
    nb = 1
    for cand in range(1, max_nb + 1):
        if n % cand == 0:
            nb = cand
    return nb


def global_mask_weighted_pooling_head(features, part_masks, *,
                                      compute_dtype=jnp.bfloat16):
    """features: [N, D, H, W], part_masks: [N, M, H, W] -> [N, M, D]."""
    N, D, H, W = features.shape
    Nm, M, Hm, Wm = part_masks.shape
    assert (N, H, W) == (Nm, Hm, Wm)
    HW = H * W
    out_dtype = features.dtype

    # TODO(synk): normalization='batch_norm_{1d,2d,3d}' variants (running-stat
    # BatchNorm over the flattened N*M batch) are not implemented; only the
    # default 'identity' normalization is reproduced here.

    if compute_dtype is not None:
        features = features.astype(compute_dtype)
        part_masks = part_masks.astype(compute_dtype)

    # Glue: pure reshapes only — no transpose, no extra HBM traffic.
    masks_k = part_masks.reshape(N, M, HW)   # [N, M, HW]
    feat_k = features.reshape(N, D, HW)      # [N, D, HW] (HW on lanes)

    itemsize = jnp.dtype(masks_k.dtype).itemsize
    nb = _pick_batch_tile(N, M, D, HW, itemsize)

    kernel = functools.partial(_mask_weighted_avg_pool_kernel,
                               inv_hw=1.0 / float(HW))

    out = pl.pallas_call(
        kernel,
        out_shape=jax.ShapeDtypeStruct((N, M, D), out_dtype),
        grid_spec=pltpu.PrefetchScalarGridSpec(
            num_scalar_prefetch=0,
            grid=(N // nb,),
            in_specs=[
                pl.BlockSpec((nb, M, HW), lambda n: (n, 0, 0)),
                pl.BlockSpec((nb, D, HW), lambda n: (n, 0, 0)),
            ],
            out_specs=pl.BlockSpec((nb, M, D), lambda n: (n, 0, 0)),
        ),
        compiler_params=pltpu.CompilerParams(
            dimension_semantics=("parallel",)),
    )(masks_k, feat_k)
    return out


def _reference(features, part_masks):
    # Pure-JAX f32 reference mirroring the PyTorch forward.
    pm = part_masks[:, :, None, :, :]        # [N, M, 1, H, W]
    ft = features[:, None, :, :, :]          # [N, 1, D, H, W]
    parts = pm * ft                          # [N, M, D, H, W]
    return jnp.mean(parts, axis=(-2, -1))    # [N, M, D]


if __name__ == "__main__":
    key = jax.random.PRNGKey(0)
    k_feat, k_mask = jax.random.split(key)

    N, D, H, W = 2, 32, 16, 16   # batch, channels ("depth"), spatial
    M = 8                        # number of body parts / masks

    features = jax.random.normal(k_feat, (N, D, H, W), dtype=jnp.float32)
    # part masks in [0, 1] like softmaxed attention maps
    part_masks = jax.nn.softmax(
        jax.random.normal(k_mask, (N, M, H, W), dtype=jnp.float32), axis=1)

    out = global_mask_weighted_pooling_head(features, part_masks)
    out = jax.block_until_ready(out)

    ref = _reference(features, part_masks)
    assert out.shape == (N, M, D), out.shape
    # bf16 inputs with f32 accumulation: loosen tolerance vs the f32 reference.
    assert jnp.allclose(out, ref, atol=5e-3, rtol=5e-2), \
        float(jnp.max(jnp.abs(out - ref)))

    print("KERNEL_OK")
</pallas_src>

<mosaic_0001>
module attributes {stable_mosaic.version = 11 : i64} {
  func.func @_mask_weighted_avg_pool_kernel(%arg0: i32, %arg1: memref<1x8x256xbf16, #tpu.memory_space<vmem>>, %arg2: memref<1x32x256xbf16, #tpu.memory_space<vmem>>, %arg3: memref<1x8x32xf32, #tpu.memory_space<vmem>>) attributes {dimension_semantics = [#tpu.dimension_semantics<parallel>], iteration_bounds = array<i64: 2>, scalar_prefetch = 0 : i64, scratch_operands = 0 : i64, tpu.core_type = #tpu.core_type<tc>, window_params = [{transform_indices = @transform_0, window_bounds = array<i64: 1, 8, 256>}, {transform_indices = @transform_1, window_bounds = array<i64: 1, 32, 256>}, {transform_indices = @transform_2, window_bounds = array<i64: 1, 8, 32>}]} {
    %c0 = arith.constant 0 : index
    %c0_0 = arith.constant 0 : index
    %c0_1 = arith.constant 0 : index
    %0 = vector.load %arg1[%c0, %c0_0, %c0_1] : memref<1x8x256xbf16, #tpu.memory_space<vmem>>, vector<1x8x256xbf16>
    %c0_2 = arith.constant 0 : index
    %c0_3 = arith.constant 0 : index
    %c0_4 = arith.constant 0 : index
    %1 = vector.load %arg2[%c0_2, %c0_3, %c0_4] : memref<1x32x256xbf16, #tpu.memory_space<vmem>>, vector<1x32x256xbf16>
    "tpu.trace_start"() <{level = 10 : i32, message = "bmh,bdh->bmd"}> : () -> ()
    %cst = arith.constant dense<0.000000e+00> : vector<1x8x32xf32>
    %2 = tpu.matmul %0, %1, %cst {dimension_numbers = #tpu.dot_dimension_numbers<[2], [2], [1], [1], [0, 0, 0, 1, 1, 1], [0], [0]>} : vector<1x8x256xbf16>, vector<1x32x256xbf16>, vector<1x8x32xf32> -> vector<1x8x32xf32>
    "tpu.trace_stop"() : () -> ()
    %cst_5 = arith.constant 3.906250e-03 : f32
    %3 = vector.broadcast %cst_5 : f32 to vector<1x8x32xf32>
    %4 = arith.mulf %2, %3 : vector<1x8x32xf32>
    %c0_6 = arith.constant 0 : index
    %c0_7 = arith.constant 0 : index
    %c0_8 = arith.constant 0 : index
    %5 = vector.load %arg3[%c0_6, %c0_7, %c0_8] : memref<1x8x32xf32, #tpu.memory_space<vmem>>, vector<1x8x32xf32>
    tpu.vector_store %arg3[%c0_6, %c0_7, %c0_8], %4 {strides = array<i32>} : memref<1x8x32xf32, #tpu.memory_space<vmem>>, vector<1x8x32xf32>,
    return
  }
  func.func @transform_0(%arg0: i32) -> (i32, i32, i32) {
    %c0_i32 = arith.constant 0 : i32
    %c0_i32_0 = arith.constant 0 : i32
    %c0_i32_1 = arith.constant 0 : i32
    return %arg0, %c0_i32, %c0_i32_0 : i32, i32, i32
  }
  func.func @transform_1(%arg0: i32) -> (i32, i32, i32) {
    %c0_i32 = arith.constant 0 : i32
    %c0_i32_0 = arith.constant 0 : i32
    %c0_i32_1 = arith.constant 0 : i32
    return %arg0, %c0_i32, %c0_i32_0 : i32, i32, i32
  }
  func.func @transform_2(%arg0: i32) -> (i32, i32, i32) {
    %c0_i32 = arith.constant 0 : i32
    %c0_i32_0 = arith.constant 0 : i32
    %c0_i32_1 = arith.constant 0 : i32
    return %arg0, %c0_i32, %c0_i32_0 : i32, i32, i32
  }
}

</mosaic_0001>

<bundles_post_ra>
// kernel: tpu_custom_call.1
= control target key start
LH: loop header
LB: loop body
LE: loop exit
PB: predicated region body
PF: predicated region fallthrough
CT: control target
= control target key end

     0   :  { %7 = vsyncpa [#allocation3], 0  ;;  %s833_s0 = inlined_call_operand.hbm [shape: bf16[2,8,256], index: 0, kind: input, shape index: {}]   ;;  %s834_s1 = inlined_call_operand.hbm [shape: bf16[2,32,256], index: 1, kind: input, shape index: {}]   ;;  %s835_s2 = inlined_call_operand.hbm [shape: f32[2,8,32], index: 2, kind: output, shape index: {}]  }
   0x1   :  { %9 = vsyncpa [#allocation3 + $0x1], 0 }
   0x2   :  { %10 = vsyncpa [#allocation6], 0 }
   0x3   :  { %12 = vsyncpa [#allocation6 + $0x1], 0 }
   0x4   :  { %13 = vsyncpa [#allocation4], 0 }
   0x5   :  { %15 = vsyncpa [#allocation4 + $0x1], 0  ;;  %s621_s9 = smov 0   ;;  %s623_s10 = smov 0  }
   0x6   :  { %s625_s11 = smov 0   ;;  %s627_s12 = smov 0  }
   0x7 LB: > { %s642_s13 = sadd.s32 4294967295, %s599_s12   ;;  %s383_s14 = sadd.s32 4294967294, %s599_s12   ;;  %s599_s12 = sphi %s627_s12, %s853_s12   ;;  %s595_s11 = sphi %s625_s11, %s852_s11   ;;  %s591_s10 = sphi %s623_s10, %s851_s10   ;;  %s587_s9 = sphi %s621_s9, %s850_s9  }
   0x8   : > { %s646_s15 = sadd.s32 1, %s599_s12   ;;  %s28_s16 = sadd.s32 1, %s595_s11 }
   0x9   : > { %s25_s17 = ssub.s32 %s599_s12, %s646_s15  ;;  %p35_p0 = scmp.ne.s32.totalorder %s595_s11, %s591_s10 }
   0xa   : > { %p26_p1 = scmp.eq.s32.totalorder %s25_s17, 0  ;;  %p36_p2 = scmp.eq.s32.totalorder %s599_s12, 0 }
   0xb   : > { %p41_p3 = scmp.ne.s32.totalorder %s591_s10, %s587_s9  ;;  %p42_p4 = scmp.eq.s32.totalorder %s642_s13, 0 }
   0xc   : > { %s658_s18 = scalar_select %p26_p1, %s595_s11, %s28_s16  }
   0xd   : > { %p660_p5 = por %p36_p2, %p35_p0  ;;  %p664_p6 = por %p42_p4, %p41_p3 }
   0xe   : > { %p91_p7 = scmp.eq.s32.totalorder %s642_s13, 1  ;;  %p97_p8 = scmp.eq.s32.totalorder %s383_s14, 1 }
   0xf   : > { %s839_s20 = scalar_select %p664_p6, 1, 0 }
  0x10   : > { %p425_p10 = scmp.lt.s32.totalorder %s599_s12, 2  ;;  %p671_p11 = por %p91_p7, %p35_p0 }
  0x11   : > { %p675_p12 = por %p97_p8, %p41_p3  ;;  %s680_s23 = sand.u32 1, %s595_s11  }
  0x12   : > { %s840_s21 = scalar_select %p671_p11, 1, 0 }
  0x13   : > { %s841_s22 = scalar_select %p675_p12, 1, 0 }
  0x14   : > { %s406_s24 = sshll.u32 %s599_s12, 7  ;;  %s386_s25 = sshll.u32 %s680_s23, 3 }
  0x15   : > { %s687_s28 = scalar_lea.hbm %s833_s0, %s406_s24  ;;  %s121_s29 = scalar_lea.vmem [#allocation2], %s386_s25 }
  0x16   : > { %s129_s30 = sshll.u32 %s121_s29, 4  ;;  %p691_p13 = pnand %p425_p10, %p660_p5  ;;  %s695_s30 = int_to_ptr.vmem [resolvable:$true] %s129_s30 }
  0x17   : > { %s118_s4 = scalar_lea.sflag [#allocation3], %s680_s23  ;;  %s469_s5 = scalar_lea.hbm %s687_s28, 128 }
  0x18   : > { %p470_p2 = scmp.ne.s32.totalorder %s687_s28, %s469_s5  ;;  %p471_p3 = pneg %p691_p13 }
  0x19   : > { %s474_s8 = scalar_lea.hbm %s833_s0, 256  ;;  %p475_p5 = scmp.lt.u32.totalorder %s687_s28, %s833_s0 }
  0x1a   : > { %p472_p4 = pnand %p471_p3, %p470_p2  ;;  %p476_p8 = scmp.lt.u32.totalorder %s474_s8, %s469_s5 }
  0x1b   : > { %p478_p9 = scmp.lt.u32.totalorder %s469_s5, %s687_s28 }
  0x1c   : > { %p473_p7 = pneg %p472_p4  ;;  %p477_p10 = por %p476_p8, %p475_p5 }
  0x1e   : > { %p479_p0 = por %p478_p9, %p477_p10 }
  0x20   : > { %p480_p1 = pnand %p479_p0, %p473_p7 }
  0x22   : > { %483 = shalt.err (!%p480_p1)
}
  0x23   : > { %s484_s17 = scalar_lea.vmem %s695_s30, 128  ;;  %s601_s19 = smov [#allocation2]  }
  0x24   : > { %p485_p2 = scmp.ne.s32.totalorder %s695_s30, %s484_s17  ;;  %s489_s24 = sshll.u32 %s601_s19, 4  ;;  %s490_s24 = int_to_ptr.vmem [resolvable:$false] %s489_s24 }
  0x25   : > { %s491_s25 = scalar_lea.vmem %s490_s24, 256  ;;  %p492_p11 = scmp.lt.s32.totalorder %s695_s30, %s490_s24 }
  0x26   : > { %p487_p4 = pnand %p485_p2, %p471_p3  ;;  %p493_p5 = scmp.lt.s32.totalorder %s491_s25, %s484_s17 }
  0x28   : > { %p488_p12 = pneg %p487_p4  ;;  %p494_p8 = por %p493_p5, %p492_p11 }
  0x2a   : > { %p495_p9 = pnand %p494_p8, %p488_p12 }
  0x2c   : > { %498 = shalt.err (!%p495_p9)
}
  0x2d   : > { %417 = dma.hbm_to_vmem [thread:$0]  (!%p691_p13), %s687_s28, 128, %s695_s30, %s118_s4  }
  0x2e   : > { %p843_p0 = scmp.lt.s32.totalorder %s599_s12, 3  ;;  %p844_p1 = scmp.ge.s32.totalorder %s599_s12, 1 }
  0x2f   : > { %s389_s27 = sshll.u32 %s680_s23, 5  ;;  %s407_s29 = sshll.u32 %s599_s12, 9 }
  0x30   : > { %p729_p7 = pnand %p844_p1, %p843_p0  ;;  %s738_s7 = scalar_lea.hbm %s834_s1, %s407_s29 }
  0x31   : > { %s140_s8 = scalar_lea.vmem [#allocation5], %s389_s27  ;;  %s137_s28 = scalar_lea.sflag [#allocation6], %s680_s23 }
  0x32   : > { %s147_s14 = sshll.u32 %s140_s8, 4  ;;  %s499_s30 = scalar_lea.hbm %s738_s7, 512  ;;  %s740_s14 = int_to_ptr.vmem [resolvable:$true] %s147_s14 }
  0x33   : > { %p500_p11 = scmp.ne.s32.totalorder %s738_s7, %s499_s30  ;;  %s504_s17 = scalar_lea.hbm %s834_s1, 1024 }
  0x34   : > { %p505_p2 = scmp.lt.u32.totalorder %s738_s7, %s834_s1  ;;  %p506_p4 = scmp.lt.u32.totalorder %s504_s17, %s499_s30 }
  0x35   : > { %p502_p12 = pnand %p500_p11, %p471_p3  ;;  %p508_p8 = scmp.lt.u32.totalorder %s499_s30, %s738_s7 }
  0x36   : > { %p507_p5 = por %p506_p4, %p505_p2 }
  0x37   : > { %p503_p10 = pneg %p502_p12 }
  0x38   : > { %p509_p9 = por %p508_p8, %p507_p5 }
  0x3a   : > { %p510_p0 = pnand %p509_p9, %p503_p10 }
  0x3c   : > { %513 = shalt.err (!%p510_p0)
}
  0x3d   : > { %s514_s25 = scalar_lea.vmem %s740_s14, 512  ;;  %s602_s27 = smov [#allocation5]  }
  0x3e   : > { %p515_p1 = scmp.ne.s32.totalorder %s740_s14, %s514_s25  ;;  %s519_s29 = sshll.u32 %s602_s27, 4  ;;  %s520_s29 = int_to_ptr.vmem [resolvable:$false] %s519_s29 }
  0x3f   : > { %s521_s5 = scalar_lea.vmem %s520_s29, 1024  ;;  %p522_p6 = scmp.lt.s32.totalorder %s740_s14, %s520_s29 }
  0x40   : > { %p517_p11 = pnand %p515_p1, %p471_p3  ;;  %p523_p2 = scmp.lt.s32.totalorder %s521_s5, %s514_s25 }
  0x42   : > { %p518_p12 = pneg %p517_p11  ;;  %p524_p4 = por %p523_p2, %p522_p6 }
  0x44   : > { %p525_p5 = pnand %p524_p4, %p518_p12 }
  0x46   : > { %528 = shalt.err (!%p525_p5)
}
  0x47   : > { %s603_s6 = smov 128   ;;  %s604_s8 = smov 8  }
  0x48   : > { %420 = dma.hbm_to_vmem [thread:$0]  (!%p691_p13), %s738_s7, 512, %s740_s14, %s137_s28, %s603_s6, %s603_s6, %s604_s8  }
  0x49   : > { %159 = sbr.rel (%p729_p7) target bundleno = 329 (0x149), region = 28  ;;  %s771_s30 = sand.u32 (!%p729_p7), 1, %s591_s10  }
  0x4a   : > { %s393_s4 = sshll.u32 (!%p729_p7), %s771_s30, 3  ;;  %s162_s16 = scalar_lea.sflag (!%p729_p7), [#allocation3], %s771_s30 }
  0x4b   : > { %s165_s17 = scalar_lea.vmem (!%p729_p7), [#allocation2], %s393_s4  ;;  %p846_p6 = scmp.ne.s32.totalorder (!%p729_p7), %s839_s20, 0 }
  0x50   : > { %574 = dma.done.wait (%p846_p6), %s162_s16, 128  }
  0x51   : > { %576 = vsyncadd (%p846_p6), %s162_s16, 4294967168  ;;  %s394_s23 = sshll.u32 %s771_s30, 5  ;;  %s171_s3 = scalar_lea.sflag [#allocation6], %s771_s30 }
  0x52   : > { %s174_s26 = scalar_lea.vmem [#allocation5], %s394_s23 }
  0x53   : > { %578 = dma.done.wait (%p846_p6), %s171_s3, 512  }
  0x54   : > { %580 = vsyncadd (%p846_p6), %s171_s3, 4294966784  ;;  %v461_v0 = vld [vmem:[%s174_s26 + $0x4] ss:$8 sps:$4 sm:$0xff]   ;;  %v463_v1 = vld [vmem:[%s174_s26] ss:$8 sps:$4 sm:$0xff]   ;;  %s403_s7 = sshll.u32 %s642_s13, 7 }
  0x55   : > { %233 = vmatprep.subr.bf16.mxu0 %v461_v0  ;;  %v464_v2 = vld [vmem:[%s174_s26 + $0x14] ss:$8 sps:$4 sm:$0xff]   ;;  %v466_v5 = vld [vmem:[%s174_s26 + $0x10] ss:$8 sps:$4 sm:$0xff]   ;;  %s199_s14 = scalar_lea.vmem [#allocation7], %s393_s4  ;;  %vm274_vm0 = vcmask 261120   ;;  %s789_s24 = scalar_lea.hbm %s835_s2, %s403_s7 }
  0x56   : > { %v201_v3 = vld [vmem:[%s165_s17] sm:$0xff]  ;;  %234 = vmatpush1.bf16.xpose.msra.mxu0 %v463_v1  ;;  %s290_s20 = sshll.u32 %s199_s14, 4  ;;  %s277_s13 = scalar_lea.sflag [#allocation4], %s771_s30  ;;  %s791_s20 = int_to_ptr.vmem [resolvable:$true] %s290_s20 }
  0x57   : > { %v397_v4 = vcombine.high %v201_v3, %v201_v3  ;;  %235 = vmatprep.subr.bf16.mxu0 %v464_v2  ;;  %v396_v6 = vcombine.low %v201_v3, %v201_v3  ;;  %s529_s25 = scalar_lea.vmem %s791_s20, 128  ;;  %p847_p3 = scmp.ne.s32.totalorder %s840_s21, 0 }
  0x58   : > { %p530_p13 = scmp.ne.s32.totalorder %s791_s20, %s529_s25  ;;  %s605_s27 = smov [#allocation7]  }
  0x59   : > { %265 = vmatprep.mubr.bf16.mxu0 %v397_v4  ;;  %s533_s29 = sshll.u32 %s605_s27, 4  ;;  %s534_s29 = int_to_ptr.vmem [resolvable:$false] %s533_s29 }
  0x5a   : > { %p531_p7 = pnand %p530_p13, %p847_p3  ;;  %s535_s5 = scalar_lea.vmem %s534_s29, 256 }
  0x5b   : > { %p536_p8 = scmp.lt.s32.totalorder %s791_s20, %s534_s29  ;;  %p537_p9 = scmp.lt.s32.totalorder %s535_s5, %s529_s25 }
  0x5c   : > { %p532_p10 = pneg %p531_p7 }
  0x5d   : > { %p538_p0 = por %p537_p9, %p536_p8 }
  0x5e   : > { %236 = vmatpush1.bf16.xpose.msra.mxu0 %v466_v5 }
  0x5f   : > { %p539_p1 = pnand %p538_p0, %p532_p10 }
  0x65   : > { %266 = vmatmul.mubr.bf16.vlgmr.msra.gmra.mrb[0].mxu0 %v396_v6 }
 0x138   : > { %v267_v7 = vpop.f32.mrb[0].mxu0 }
 0x139   : > { %v273_v8 = vmul.f32 0.00390625, %v267_v7  ;;  %v269_v9 = vpop.f32.mrb[1].mxu0 }
 0x13a   : > { %v270_v10 = vpop.f32.mrb[2].mxu0 }
 0x13b   : > { %v271_v11 = vpop.f32.mrb[3].mxu0  ;;  %275 = vst.msk [vmem:[%s199_s14] sm:$0xff] %vm274_vm0, %v273_v8 }
 0x13c   : > { %542 = shalt.err (!%p539_p1)
}
 0x13d   : > { %s543_s6 = scalar_lea.hbm %s789_s24, 128  ;;  %s547_s4 = scalar_lea.hbm %s835_s2, 256 }
 0x13e   : > { %p544_p11 = scmp.ne.s32.totalorder %s789_s24, %s543_s6  ;;  %p548_p4 = scmp.lt.u32.totalorder %s789_s24, %s835_s2 }
 0x13f   : > { %p549_p5 = scmp.lt.u32.totalorder %s547_s4, %s543_s6  ;;  %p551_p13 = scmp.lt.u32.totalorder %s543_s6, %s789_s24 }
 0x140   : > { %p545_p12 = pnand %p544_p11, %p847_p3 }
 0x141   : > { %p550_p6 = por %p549_p5, %p548_p4 }
 0x142   : > { %p546_p2 = pneg %p545_p12 }
 0x143   : > { %p552_p7 = por %p551_p13, %p550_p6 }
 0x145   : > { %p553_p10 = pnand %p552_p7, %p546_p2 }
 0x147   : > { %556 = shalt.err (!%p553_p10)
}
 0x148   : > { %412 = dma.vmem_to_hbm [thread:$0]  (%p847_p3), %s791_s20, 128, %s789_s24, %s277_s13  }
 0x149 PF: > { %s302_s23 = sand.u32 1, %s587_s9   ;;  %p848_p8 = scmp.ne.s32.totalorder %s841_s22, 0 }
 0x14a   : > { %p849_p9 = scmp.ge.s32.totalorder %s599_s12, 2  ;;  %s303_s3 = scalar_lea.sflag [#allocation4], %s302_s23 }
 0x14c   : > { %p422_p0 = pnand %p849_p9, %p848_p8 }
 0x14e   : > { %582 = dma.done.wait (!%p422_p0), %s303_s3, 128  }
 0x14f   : > { %584 = vsyncadd (!%p422_p0), %s303_s3, 4294967168  ;;  %p18_p1 = scmp.ge.s32.totalorder %s646_s15, 4   ;;  %s850_s9 = smov %s591_s10 }
 0x150   : > { %s851_s10 = smov %s595_s11  ;;  %s852_s11 = smov %s658_s18 }
 0x151   : > { %s853_s12 = smov %s646_s15  ;;  %20 = sbr.rel (!%p18_p1) target bundleno = 7 (0x7), region = 86 }
 0x158   :  { %308 = vsyncpa [#allocation3], 1 }
 0x159   :  { %310 = vsyncpa [#allocation3 + $0x1], 1 }
 0x15a   :  { %311 = vsyncpa [#allocation6], 1 }
 0x15b   :  { %313 = vsyncpa [#allocation6 + $0x1], 1 }
 0x15c   :  { %314 = vsyncpa [#allocation4], 1 }
 0x15d   :  { %316 = vsyncpa [#allocation4 + $0x1], 1 }

</bundles_post_ra>
